<compile_context>
chip_gen: v6e
topology: v6e:2x2x1
jax: 0.10.0
libtpu: 0.0.40
codegen_flags: <defaults>
</compile_context>

<pallas_src>
import jax
import jax.numpy as jnp
from jax.experimental import pallas as pl
from jax.experimental.pallas import tpu as pltpu


def sigmoid_mul(x188, x184, *, num_blocks=2):
    """Computes sigmoid(x188) * x184 with NCHW broadcasting (SE-style gating).

    x188: (N, C, 1, 1) per-channel pre-sigmoid gate
    x184: (N, C, H, W) feature map
    returns (N, C, H, W)
    """
    N, C, H, W = x184.shape
    assert x188.shape == (N, C, 1, 1)
    rows = N * C
    HW = H * W
    out_dtype = x184.dtype

    # --- tile selection -----------------------------------------------------
    # Target `num_blocks` grid steps; tc must be a multiple of 8 (sublane rule)
    # unless it equals the full row extent.  Cap the block so in+out double
    # buffers stay comfortably inside scoped VMEM on every TPU generation.
    itemsize = jnp.dtype(out_dtype).itemsize
    max_block_bytes = 8 * 1024 * 1024
    max_tc = max(8, ((max_block_bytes // (HW * itemsize)) // 8) * 8)

    if rows < 8 * num_blocks:
        tc = rows                                   # single full-extent block
    else:
        tc = ((pl.cdiv(rows, num_blocks) + 7) // 8) * 8
        tc = min(tc, max_tc)
    grid = pl.cdiv(rows, tc)

    # Gate column: pad to grid*tc rows so the in-kernel dynamic slice of the
    # resident gate is always in bounds even when the last block is ragged.
    s2d = x188.reshape(rows, 1)
    rows_padded = grid * tc
    if rows_padded != rows:
        s2d = jnp.pad(s2d, ((0, rows_padded - rows), (0, 0)))
    x2d = x184.reshape(rows, HW)

    def kernel(s_ref, x_ref, o_ref):
        # s_ref: (rows_padded, 1) grid-resident gate (constant index_map)
        # x_ref: (tc, HW) feature-map rows;  o_ref: (tc, HW)
        i = pl.program_id(0)
        start = i * tc
        if tc % 8 == 0:
            start = pl.multiple_of(start, 8)
        s = s_ref[pl.ds(start, tc), :]
        # sigmoid in f32 on the tiny (tc, 1) column only (EUP), then multiply
        # in the feature-map dtype (no blanket f32 upcast of the big tensor).
        gate = jax.nn.sigmoid(s.astype(jnp.float32)).astype(o_ref.dtype)
        o_ref[...] = gate * x_ref[...]

    out2d = pl.pallas_call(
        kernel,
        out_shape=jax.ShapeDtypeStruct((rows, HW), out_dtype),
        grid_spec=pltpu.PrefetchScalarGridSpec(
            num_scalar_prefetch=0,
            grid=(grid,),
            in_specs=[
                pl.BlockSpec((rows_padded, 1), lambda i: (0, 0)),
                pl.BlockSpec((tc, HW), lambda i: (i, 0)),
            ],
            out_specs=pl.BlockSpec((tc, HW), lambda i: (i, 0)),
        ),
        compiler_params=pltpu.CompilerParams(
            dimension_semantics=("parallel",)
        ),
    )(s2d, x2d)

    return out2d.reshape(N, C, H, W)


# TODO(synk): for end-to-end wins this gate-multiply should ideally be fused as
# an epilogue of the op producing x184 rather than a standalone ~1us kernel.

if __name__ == "__main__":
    key = jax.random.PRNGKey(0)
    k1, k2 = jax.random.split(key)
    # Shapes implied by the module: x184 = (1, 640, 14, 14), x188 = (1, 640, 1, 1)
    x184 = jax.random.normal(k1, (1, 640, 14, 14), dtype=jnp.float32)
    x188 = jax.random.normal(k2, (1, 640, 1, 1), dtype=jnp.float32)

    out = sigmoid_mul(x188, x184)
    out = jax.block_until_ready(out)

    # correctness check against plain JAX reference
    ref = jax.nn.sigmoid(x188) * x184
    assert out.shape == ref.shape
    assert jnp.allclose(out, ref, atol=1e-6, rtol=1e-6)

    print("KERNEL_OK")
</pallas_src>

<mosaic_0001>
module attributes {stable_mosaic.version = 11 : i64} {
  func.func @kernel(%arg0: i32, %arg1: memref<640x1xf32, #tpu.memory_space<vmem>>, %arg2: memref<320x196xf32, #tpu.memory_space<vmem>>, %arg3: memref<320x196xf32, #tpu.memory_space<vmem>>) attributes {dimension_semantics = [#tpu.dimension_semantics<parallel>], iteration_bounds = array<i64: 2>, scalar_prefetch = 0 : i64, scratch_operands = 0 : i64, tpu.core_type = #tpu.core_type<tc>, window_params = [{pipeline_mode = #tpu.pipeline_mode<synchronous>, transform_indices = @transform_0, window_bounds = array<i64: 640, 1>}, {transform_indices = @transform_1, window_bounds = array<i64: 320, 196>}, {transform_indices = @transform_2, window_bounds = array<i64: 320, 196>}]} {
    %c320_i32 = arith.constant 320 : i32
    %0 = arith.muli %arg0, %c320_i32 : i32
    %1 = tpu.assume_multiple %0, 8 : i32
    %2 = arith.index_cast %1 : i32 to index
    %c0 = arith.constant 0 : index
    %3 = vector.load %arg1[%2, %c0] : memref<640x1xf32, #tpu.memory_space<vmem>>, vector<320x1xf32>
    %4 = arith.negf %3 : vector<320x1xf32>
    %5 = math.exp %4 : vector<320x1xf32>
    %cst = arith.constant 1.000000e+00 : f32
    %6 = vector.broadcast %cst : f32 to vector<320x1xf32>
    %7 = arith.addf %6, %5 : vector<320x1xf32>
    %8 = arith.divf %6, %7 : vector<320x1xf32>
    %c0_0 = arith.constant 0 : index
    %c0_1 = arith.constant 0 : index
    %9 = vector.load %arg2[%c0_0, %c0_1] : memref<320x196xf32, #tpu.memory_space<vmem>>, vector<320x196xf32>
    %10 = vector.broadcast %8 : vector<320x1xf32> to vector<320x196xf32>
    %11 = arith.mulf %10, %9 : vector<320x196xf32>
    %c0_2 = arith.constant 0 : index
    %c0_3 = arith.constant 0 : index
    %12 = vector.load %arg3[%c0_2, %c0_3] : memref<320x196xf32, #tpu.memory_space<vmem>>, vector<320x196xf32>
    tpu.vector_store %arg3[%c0_2, %c0_3], %11 {strides = array<i32>} : memref<320x196xf32, #tpu.memory_space<vmem>>, vector<320x196xf32>,
    return
  }
  func.func @transform_0(%arg0: i32) -> (i32, i32) {
    %c0_i32 = arith.constant 0 : i32
    %c0_i32_0 = arith.constant 0 : i32
    %c0_i32_1 = arith.constant 0 : i32
    return %c0_i32, %c0_i32_0 : i32, i32
  }
  func.func @transform_1(%arg0: i32) -> (i32, i32) {
    %c0_i32 = arith.constant 0 : i32
    %c0_i32_0 = arith.constant 0 : i32
    return %arg0, %c0_i32 : i32, i32
  }
  func.func @transform_2(%arg0: i32) -> (i32, i32) {
    %c0_i32 = arith.constant 0 : i32
    %c0_i32_0 = arith.constant 0 : i32
    return %arg0, %c0_i32 : i32, i32
  }
}

</mosaic_0001>

<bundles_post_ra>
// kernel: tpu_custom_call.1
= control target key start
LH: loop header
LB: loop body
LE: loop exit
PB: predicated region body
PF: predicated region fallthrough
CT: control target
= control target key end

     0   :  { %s1183_s9 = smov 0   ;;  %s1453_s0 = inlined_call_operand.vmem [shape: f32[640,1], index: 0, kind: input, shape index: {}]   ;;  %s1454_s1 = inlined_call_operand.vmem [shape: f32[640,196], index: 1, kind: input, shape index: {}]   ;;  %s1455_s2 = inlined_call_operand.vmem [shape: f32[640,196], index: 2, kind: output, shape index: {}]  }
   0x1 LB: > { %s935_s10 = sadd.s32 4294967295, %s1165_s9   ;;  %p939_p0 = scmp.ge.s32.totalorder %s1165_s9, 1  ;;  %s1165_s9 = sphi %s1183_s9, %s12_s9  }
   0x2   : > { %p114_p1 = scmp.lt.s32.totalorder %s1165_s9, 3 }
   0x4   : > { %p115_p2 = pnand %p939_p0, %p114_p1 }
   0x5   : > { %s152_s11 = smul.u32 (!%p115_p2), 320, %s935_s10 }
   0x6   : > { %118 = sbr.rel (%p115_p2) target bundleno = 248 (0xf8), region = 28 }
   0x7   : > { %s1196_s14 = scalar_lea.vmem (!%p115_p2), %s1453_s0, %s152_s11  ;;  %s138_s15 = smul.u32 (!%p115_p2), 40, %s935_s10 }
   0x9   : > { %p139_p3 = scmp.lt.s32.totalorder (!%p115_p2), %s138_s15, 79 }
   0xb   : > { %v1167_v0 = vmov 0   ;;  %v156_v1 = vld [vmem:[%s1196_s14 + $0x10] sm:$0xff]  ;;  %v154_v2 = vld [vmem:[%s1196_s14] sm:$0xff]  ;;  %v157_v3 = vld [vmem:[%s1196_s14 + $0x18] sm:$0xff]  ;;  %s1457_s15 = smov (!%p139_p3, %s138_s15), 79  ;;  %vm795_vm0 = vcmask 556032  }
   0xc   : > { %998 = vset.pattern.permute.xlu1 %v1167_v0  ;;  %997 = vset.pattern.permute.xlu0 %v1167_v0  ;;  %v946_v4 = vmul.f32 -1.442695, %v156_v1  ;;  %v944_v5 = vmul.f32 -1.442695, %v154_v2  ;;  %v947_v6 = vmul.f32 -1.442695, %v157_v3 }
   0xd   : > { %v155_v7 = vld [vmem:[%s1196_s14 + $0x8] sm:$0xff]  ;;  %v158_v9 = vld [vmem:[%s1196_s14 + $0x20] sm:$0xff]  ;;  %v161_v13 = vld [vmem:[%s1196_s14 + $0x38] sm:$0xff]  ;;  %s986_s16 = sshll.u32 %s1457_s15, 4 }
   0xe   : > { %v159_v8 = vld [vmem:[%s1196_s14 + $0x28] sm:$0xff]  ;;  %999 = vpow2.f32 %v946_v4  ;;  %v945_v10 = vmul.f32 -1.442695, %v155_v7  ;;  %v948_v12 = vmul.f32 -1.442695, %v158_v9  ;;  %v160_v14 = vld [vmem:[%s1196_s14 + $0x30] sm:$0xff]  ;;  %s1243_s19 = scalar_lea.vmem %s1454_s1, %s986_s16  ;;  %s1252_s22 = scalar_lea.vmem %s1455_s2, %s986_s16 }
   0xf   : > { %v949_v11 = vmul.f32 -1.442695, %v159_v8  ;;  %1001 = vpow2.f32 %v944_v5  ;;  %v163_v15 = vld [vmem:[%s1196_s14 + $0x48] sm:$0xff]  ;;  %v951_v16 = vmul.f32 -1.442695, %v161_v13  ;;  %v162_v18 = vld [vmem:[%s1196_s14 + $0x40] sm:$0xff] }
  0x10   : > { %1003 = vpow2.f32 %v947_v6  ;;  %v950_v17 = vmul.f32 -1.442695, %v160_v14  ;;  %v165_v19 = vld [vmem:[%s1196_s14 + $0x58] sm:$0xff]  ;;  %v953_v20 = vmul.f32 -1.442695, %v163_v15  ;;  %v164_v21 = vld [vmem:[%s1196_s14 + $0x50] sm:$0xff] }
  0x11   : > { %1005 = vpow2.f32 %v945_v10  ;;  %v952_v22 = vmul.f32 -1.442695, %v162_v18  ;;  %v167_v23 = vld [vmem:[%s1196_s14 + $0x68] sm:$0xff]  ;;  %v955_v24 = vmul.f32 -1.442695, %v165_v19  ;;  %v166_v25 = vld [vmem:[%s1196_s14 + $0x60] sm:$0xff] }
  0x12   : > { %1007 = vpow2.f32 %v949_v11  ;;  %v954_v26 = vmul.f32 -1.442695, %v164_v21  ;;  %v169_v27 = vld [vmem:[%s1196_s14 + $0x78] sm:$0xff]  ;;  %v957_v28 = vmul.f32 -1.442695, %v167_v23  ;;  %v168_v29 = vld [vmem:[%s1196_s14 + $0x70] sm:$0xff] }
  0x13   : > { %1009 = vpow2.f32 %v948_v12  ;;  %v956_v30 = vmul.f32 -1.442695, %v166_v25  ;;  %v959_v31 = vmul.f32 -1.442695, %v169_v27  ;;  %v958_v32 = vmul.f32 -1.442695, %v168_v29 }
  0x14   : > { %1011 = vpow2.f32 %v951_v16  ;;  %v171_v58 = vld [vmem:[%s1196_s14 + $0x88] sm:$0xff]  ;;  %v170_v61 = vld [vmem:[%s1196_s14 + $0x80] sm:$0xff]  ;;  %v173_v0 = vld [vmem:[%s1196_s14 + $0x98] sm:$0xff] }
  0x15   : > { %1013 = vpow2.f32 %v950_v17  ;;  %v961_v3 = vmul.f32 -1.442695, %v171_v58  ;;  %v172_v4 = vld [vmem:[%s1196_s14 + $0x90] sm:$0xff]  ;;  %v960_v7 = vmul.f32 -1.442695, %v170_v61  ;;  %v175_v8 = vld [vmem:[%s1196_s14 + $0xa8] sm:$0xff] }
  0x16   : > { %1015 = vpow2.f32 %v953_v20  ;;  %v963_v10 = vmul.f32 -1.442695, %v173_v0  ;;  %v174_v11 = vld [vmem:[%s1196_s14 + $0xa0] sm:$0xff]  ;;  %v962_v13 = vmul.f32 -1.442695, %v172_v4  ;;  %v177_v14 = vld [vmem:[%s1196_s14 + $0xb8] sm:$0xff] }
  0x17   : > { %1017 = vpow2.f32 %v952_v22  ;;  %v965_v16 = vmul.f32 -1.442695, %v175_v8  ;;  %v176_v17 = vld [vmem:[%s1196_s14 + $0xb0] sm:$0xff]  ;;  %v964_v19 = vmul.f32 -1.442695, %v174_v11  ;;  %v179_v20 = vld [vmem:[%s1196_s14 + $0xc8] sm:$0xff] }
  0x18   : > { %1019 = vpow2.f32 %v955_v24  ;;  %v967_v22 = vmul.f32 -1.442695, %v177_v14  ;;  %v178_v23 = vld [vmem:[%s1196_s14 + $0xc0] sm:$0xff]  ;;  %v966_v25 = vmul.f32 -1.442695, %v176_v17  ;;  %v180_v29 = vld [vmem:[%s1196_s14 + $0xd0] sm:$0xff] }
  0x19   : > { %1021 = vpow2.f32 %v954_v26  ;;  %v181_v26 = vld [vmem:[%s1196_s14 + $0xd8] sm:$0xff]  ;;  %v188_v17 = vld [vmem:[%s1196_s14 + $0x110] sm:$0xff] }
  0x1a   : > { %1023 = vpow2.f32 %v957_v28  ;;  %v969_v28 = vmul.f32 -1.442695, %v179_v20  ;;  %v191_v20 = vld [vmem:[%s1196_s14 + $0x128] sm:$0xff] }
  0x1b   : > { %v1000_v33 = vpop.eup %999  ;;  %1025 = vpow2.f32 %v956_v30 }
  0x1c   : > { %v1002_v34 = vpop.eup %1001  ;;  %v316_v35 = vadd.f32 1.0, %v1000_v33  ;;  %1027 = vpow2.f32 %v959_v31  ;;  %v968_v31 = vmul.f32 -1.442695, %v178_v23  ;;  %v190_v23 = vld [vmem:[%s1196_s14 + $0x120] sm:$0xff] }
  0x1d   : > { %v1004_v36 = vpop.eup %1003  ;;  %v314_v37 = vadd.f32 1.0, %v1002_v34  ;;  %1029 = vpow2.f32 %v958_v32  ;;  %v183_v32 = vld [vmem:[%s1196_s14 + $0xe8] sm:$0xff]  ;;  %v971_v34 = vmul.f32 -1.442695, %v181_v26  ;;  %v193_v26 = vld [vmem:[%s1196_s14 + $0x138] sm:$0xff] }
  0x1e   : > { %v1006_v38 = vpop.eup %1005  ;;  %1031 = vrcp.f32 %v316_v35  ;;  %v317_v39 = vadd.f32 1.0, %v1004_v36  ;;  %v182_v35 = vld [vmem:[%s1196_s14 + $0xe0] sm:$0xff] }
  0x1f   : > { %v1008_v40 = vpop.eup %1007  ;;  %1033 = vrcp.f32 %v314_v37  ;;  %v315_v41 = vadd.f32 1.0, %v1006_v38  ;;  %v970_v37 = vmul.f32 -1.442695, %v180_v29  ;;  %v192_v29 = vld [vmem:[%s1196_s14 + $0x130] sm:$0xff] }
  0x20   : > { %v1010_v42 = vpop.eup %1009  ;;  %1035 = vrcp.f32 %v317_v39  ;;  %v319_v43 = vadd.f32 1.0, %v1008_v40  ;;  %v973_v39 = vmul.f32 -1.442695, %v183_v32 }
  0x21   : > { %v1012_v44 = vpop.eup %1011  ;;  %1037 = vrcp.f32 %v315_v41  ;;  %v318_v45 = vadd.f32 1.0, %v1010_v42  ;;  %v972_v41 = vmul.f32 -1.442695, %v182_v35  ;;  %v982_v35 = vmul.f32 -1.442695, %v192_v29  ;;  %v444_v29 = vld [vmem:[%s1243_s19 + $0x50] sm:$0xff] }
  0x22   : > { %v1014_v46 = vpop.eup %1013  ;;  %1039 = vrcp.f32 %v319_v43  ;;  %v321_v47 = vadd.f32 1.0, %v1012_v44 }
  0x23   : > { %v1016_v48 = vpop.eup %1015  ;;  %1041 = vrcp.f32 %v318_v45  ;;  %v320_v49 = vadd.f32 1.0, %v1014_v46  ;;  %v185_v46 = vld [vmem:[%s1196_s14 + $0xf8] sm:$0xff] }
  0x24   : > { %v1018_v50 = vpop.eup %1017  ;;  %1043 = vrcp.f32 %v321_v47  ;;  %v323_v51 = vadd.f32 1.0, %v1016_v48 }
  0x25   : > { %v1020_v52 = vpop.eup %1019  ;;  %1045 = vrcp.f32 %v320_v49  ;;  %v322_v53 = vadd.f32 1.0, %v1018_v50  ;;  %v184_v49 = vld [vmem:[%s1196_s14 + $0xf0] sm:$0xff] }
  0x26   : > { %v1022_v54 = vpop.eup %1021  ;;  %1047 = vrcp.f32 %v323_v51  ;;  %v325_v55 = vadd.f32 1.0, %v1020_v52 }
  0x27   : > { %v1024_v56 = vpop.eup %1023  ;;  %1049 = vrcp.f32 %v322_v53  ;;  %v324_v57 = vadd.f32 1.0, %v1022_v54  ;;  %v975_v54 = vmul.f32 -1.442695, %v185_v46 }
  0x28   : > { %v1026_v59 = vpop.eup %1025  ;;  %1051 = vrcp.f32 %v325_v55  ;;  %v327_v60 = vadd.f32 1.0, %v1024_v56 }
  0x29   : > { %v1028_v62 = vpop.eup %1027  ;;  %1053 = vrcp.f32 %v324_v57  ;;  %v326_v63 = vadd.f32 1.0, %v1026_v59  ;;  %v974_v57 = vmul.f32 -1.442695, %v184_v49 }
  0x2a   : > { %v1030_v1 = vpop.eup %1029  ;;  %1055 = vrcp.f32 %v327_v60  ;;  %v329_v2 = vadd.f32 1.0, %v1028_v62 }
  0x2b   : > { %v1032_v5 = vpop.eup %1031  ;;  %1057 = vrcp.f32 %v326_v63  ;;  %v328_v6 = vadd.f32 1.0, %v1030_v1 }
  0x2c   : > { %v1034_v9 = vpop.eup %1033  ;;  %526 = vperm.xlu1 %998, %v1032_v5   ;;  %1059 = vrcp.f32 %v329_v2 }
  0x2d   : > { %v1036_v12 = vpop.eup %1035  ;;  %516 = vperm.xlu0 %997, %v1034_v9   ;;  %1061 = vrcp.f32 %v328_v6 }
  0x2e   : > { %v1038_v15 = vpop.eup %1037  ;;  %1063 = vpow2.f32 %v961_v3 }
  0x2f   : > { %v1040_v18 = vpop.eup %1039  ;;  %1065 = vpow2.f32 %v960_v7 }
  0x30   : > { %v1042_v21 = vpop.eup %1041  ;;  %531 = vperm.xlu1 %998, %v1036_v12   ;;  %1067 = vpow2.f32 %v963_v10  ;;  %v187_v10 = vld [vmem:[%s1196_s14 + $0x108] sm:$0xff] }
  0x31   : > { %v1044_v24 = vpop.eup %1043  ;;  %521 = vperm.xlu0 %997, %v1038_v15   ;;  %1069 = vpow2.f32 %v962_v13  ;;  %v186_v13 = vld [vmem:[%s1196_s14 + $0x100] sm:$0xff]  ;;  %v189_v15 = vld [vmem:[%s1196_s14 + $0x118] sm:$0xff] }
  0x32   : > { %v1046_v27 = vpop.eup %1045  ;;  %1071 = vpow2.f32 %v965_v16  ;;  %v977_v16 = vmul.f32 -1.442695, %v187_v10  ;;  %v439_v10 = vld [vmem:[%s1243_s19 + $0x28] sm:$0xff] }
  0x33   : > { %v1048_v30 = vpop.eup %1047  ;;  %1073 = vpow2.f32 %v964_v19  ;;  %v976_v19 = vmul.f32 -1.442695, %v186_v13 }
  0x34   : > { %v1050_v33 = vpop.eup %1049  ;;  %541 = vperm.xlu1 %998, %v1040_v18   ;;  %1075 = vpow2.f32 %v967_v22  ;;  %v979_v22 = vmul.f32 -1.442695, %v189_v15 }
  0x35   : > { %v1052_v36 = vpop.eup %1051  ;;  %536 = vperm.xlu0 %997, %v1042_v21   ;;  %1077 = vpow2.f32 %v966_v25  ;;  %v978_v25 = vmul.f32 -1.442695, %v188_v17 }
  0x36   : > { %v1054_v38 = vpop.eup %1053  ;;  %1079 = vpow2.f32 %v969_v28  ;;  %v981_v28 = vmul.f32 -1.442695, %v191_v20  ;;  %v441_v20 = vld [vmem:[%s1243_s19 + $0x38] sm:$0xff] }
  0x37   : > { %v1056_v40 = vpop.eup %1055  ;;  %1081 = vpow2.f32 %v968_v31  ;;  %v980_v31 = vmul.f32 -1.442695, %v190_v23 }
  0x38   : > { %v1058_v42 = vpop.eup %1057  ;;  %551 = vperm.xlu1 %998, %v1044_v24   ;;  %1083 = vpow2.f32 %v971_v34 }
  0x39   : > { %v1060_v43 = vpop.eup %1059  ;;  %546 = vperm.xlu0 %997, %v1046_v27   ;;  %1085 = vpow2.f32 %v970_v37 }
  0x3a   : > { %v1062_v44 = vpop.eup %1061  ;;  %1087 = vpow2.f32 %v973_v39 }
  0x3b   : > { %v1064_v45 = vpop.eup %1063  ;;  %1089 = vpow2.f32 %v972_v41 }
  0x3c   : > { %v1066_v47 = vpop.eup %1065  ;;  %561 = vperm.xlu1 %998, %v1048_v30   ;;  %v331_v48 = vadd.f32 1.0, %v1064_v45 }
  0x3d   : > { %v1068_v50 = vpop.eup %1067  ;;  %556 = vperm.xlu0 %997, %v1050_v33   ;;  %v330_v51 = vadd.f32 1.0, %v1066_v47  ;;  %v983_v33 = vmul.f32 -1.442695, %v193_v26 }
  0x3e   : > { %v1070_v52 = vpop.eup %1069  ;;  %1091 = vrcp.f32 %v331_v48  ;;  %v333_v53 = vadd.f32 1.0, %v1068_v50 }
  0x3f   : > { %v1072_v55 = vpop.eup %1071  ;;  %1093 = vrcp.f32 %v330_v51  ;;  %v332_v56 = vadd.f32 1.0, %v1070_v52 }
  0x40   : > { %v1074_v58 = vpop.eup %1073  ;;  %571 = vperm.xlu1 %998, %v1052_v36   ;;  %1095 = vrcp.f32 %v333_v53  ;;  %v335_v59 = vadd.f32 1.0, %v1072_v55 }
  0x41   : > { %v1076_v60 = vpop.eup %1075  ;;  %566 = vperm.xlu0 %997, %v1054_v38   ;;  %1097 = vrcp.f32 %v332_v56  ;;  %v334_v61 = vadd.f32 1.0, %v1074_v58 }
  0x42   : > { %v1078_v62 = vpop.eup %1077  ;;  %v337_v63 = vadd.f32 1.0, %v1076_v60  ;;  %1099 = vpow2.f32 %v975_v54 }
  0x43   : > { %v1080_v0 = vpop.eup %1079  ;;  %v336_v1 = vadd.f32 1.0, %v1078_v62  ;;  %1101 = vpow2.f32 %v974_v57 }
  0x44   : > { %v1082_v2 = vpop.eup %1081  ;;  %581 = vperm.xlu1 %998, %v1056_v40   ;;  %1103 = vrcp.f32 %v335_v59  ;;  %v339_v3 = vadd.f32 1.0, %v1080_v0 }
  0x45   : > { %v1084_v4 = vpop.eup %1083  ;;  %576 = vperm.xlu0 %997, %v1058_v42   ;;  %1105 = vrcp.f32 %v334_v61  ;;  %v338_v5 = vadd.f32 1.0, %v1082_v2 }
  0x46   : > { %v1086_v6 = vpop.eup %1085  ;;  %1107 = vrcp.f32 %v337_v63  ;;  %v341_v7 = vadd.f32 1.0, %v1084_v4 }
  0x47   : > { %v1088_v8 = vpop.eup %1087  ;;  %1109 = vrcp.f32 %v336_v1  ;;  %v340_v9 = vadd.f32 1.0, %v1086_v6 }
  0x48   : > { %v1090_v11 = vpop.eup %1089  ;;  %591 = vperm.xlu1 %998, %v1060_v43   ;;  %1111 = vrcp.f32 %v339_v3  ;;  %v343_v12 = vadd.f32 1.0, %v1088_v8 }
  0x49   : > { %586 = vperm.xlu0 %997, %v1062_v44   ;;  %1113 = vrcp.f32 %v338_v5  ;;  %v342_v14 = vadd.f32 1.0, %v1090_v11  ;;  %v434_v11 = vld [vmem:[%s1243_s19] sm:$0xff] }
  0x4a   : > { %1115 = vrcp.f32 %v341_v7 }
  0x4b   : > { %v1092_v18 = vpop.eup %1091  ;;  %1117 = vrcp.f32 %v340_v9  ;;  %v438_v9 = vld [vmem:[%s1243_s19 + $0x20] sm:$0xff] }
  0x4c   : > { %v1094_v21 = vpop.eup %1093  ;;  %601 = vperm.xlu1 %998, %v1092_v18   ;;  %1119 = vrcp.f32 %v343_v12  ;;  %v435_v12 = vld [vmem:[%s1243_s19 + $0x8] sm:$0xff] }
  0x4d   : > { %v1096_v24 = vpop.eup %1095  ;;  %596 = vperm.xlu0 %997, %v1094_v21   ;;  %1121 = vrcp.f32 %v342_v14  ;;  %v436_v21 = vld [vmem:[%s1243_s19 + $0x10] sm:$0xff] }
  0x4e   : > { %v1098_v27 = vpop.eup %1097  ;;  %1123 = vpow2.f32 %v977_v16 }
  0x4f   : > { %v1100_v30 = vpop.eup %1099  ;;  %1125 = vpow2.f32 %v976_v19  ;;  %v440_v19 = vld [vmem:[%s1243_s19 + $0x30] sm:$0xff] }
  0x50   : > { %v1102_v32 = vpop.eup %1101  ;;  %611 = vperm.xlu1 %998, %v1096_v24   ;;  %1127 = vpow2.f32 %v979_v22  ;;  %v345_v39 = vadd.f32 1.0, %v1100_v30  ;;  %v437_v22 = vld [vmem:[%s1243_s19 + $0x18] sm:$0xff] }
  0x51   : > { %v1104_v34 = vpop.eup %1103  ;;  %606 = vperm.xlu0 %997, %v1098_v27   ;;  %1129 = vpow2.f32 %v978_v25  ;;  %v344_v41 = vadd.f32 1.0, %v1102_v32  ;;  %v445_v30 = vld [vmem:[%s1243_s19 + $0x58] sm:$0xff]  ;;  %v443_v32 = vld [vmem:[%s1243_s19 + $0x48] sm:$0xff] }
  0x52   : > { %v1106_v36 = vpop.eup %1105  ;;  %1131 = vpow2.f32 %v981_v28 }
  0x53   : > { %v1108_v37 = vpop.eup %1107  ;;  %1133 = vpow2.f32 %v980_v31  ;;  %v442_v31 = vld [vmem:[%s1243_s19 + $0x40] sm:$0xff] }
  0x54   : > { %v1110_v38 = vpop.eup %1109  ;;  %621 = vperm.xlu1 %998, %v1104_v34   ;;  %1135 = vpow2.f32 %v983_v33 }
  0x55   : > { %v1112_v40 = vpop.eup %1111  ;;  %616 = vperm.xlu0 %997, %v1106_v36   ;;  %1137 = vpow2.f32 %v982_v35 }
  0x56   : > { %v1114_v42 = vpop.eup %1113  ;;  %1139 = vrcp.f32 %v345_v39  ;;  %v448_v39 = vld [vmem:[%s1243_s19 + $0x70] sm:$0xff] }
  0x57   : > { %v1116_v43 = vpop.eup %1115  ;;  %1141 = vrcp.f32 %v344_v41  ;;  %v446_v41 = vld [vmem:[%s1243_s19 + $0x60] sm:$0xff] }
  0x58   : > { %v1118_v44 = vpop.eup %1117  ;;  %631 = vperm.xlu1 %998, %v1108_v37  }
  0x59   : > { %v1120_v45 = vpop.eup %1119  ;;  %626 = vperm.xlu0 %997, %v1110_v38  }
  0x5a   : > { %v1122_v46 = vpop.eup %1121 }
  0x5b   : > { %v1124_v47 = vpop.eup %1123 }
  0x5c   : > { %v1126_v48 = vpop.eup %1125  ;;  %641 = vperm.xlu1 %998, %v1112_v40   ;;  %v347_v49 = vadd.f32 1.0, %v1124_v47  ;;  %v449_v40 = vld [vmem:[%s1243_s19 + $0x78] sm:$0xff] }
  0x5d   : > { %v1128_v50 = vpop.eup %1127  ;;  %636 = vperm.xlu0 %997, %v1114_v42   ;;  %v346_v51 = vadd.f32 1.0, %v1126_v48  ;;  %v447_v42 = vld [vmem:[%s1243_s19 + $0x68] sm:$0xff] }
  0x5e   : > { %v1130_v52 = vpop.eup %1129  ;;  %1143 = vrcp.f32 %v347_v49  ;;  %v349_v53 = vadd.f32 1.0, %v1128_v50  ;;  %v452_v49 = vld [vmem:[%s1243_s19 + $0x90] sm:$0xff]  ;;  %v453_v50 = vld [vmem:[%s1243_s19 + $0x98] sm:$0xff] }
  0x5f   : > { %v1132_v54 = vpop.eup %1131  ;;  %1145 = vrcp.f32 %v346_v51  ;;  %v348_v55 = vadd.f32 1.0, %v1130_v52  ;;  %v450_v51 = vld [vmem:[%s1243_s19 + $0x80] sm:$0xff]  ;;  %v451_v52 = vld [vmem:[%s1243_s19 + $0x88] sm:$0xff] }
  0x60   : > { %v1134_v56 = vpop.eup %1133  ;;  %651 = vperm.xlu1 %998, %v1116_v43   ;;  %1147 = vrcp.f32 %v349_v53  ;;  %v351_v57 = vadd.f32 1.0, %v1132_v54 }
  0x61   : > { %v1136_v58 = vpop.eup %1135  ;;  %646 = vperm.xlu0 %997, %v1118_v44   ;;  %1149 = vrcp.f32 %v348_v55  ;;  %v350_v59 = vadd.f32 1.0, %v1134_v56 }
  0x62   : > { %v1138_v60 = vpop.eup %1137  ;;  %1151 = vrcp.f32 %v351_v57  ;;  %v353_v61 = vadd.f32 1.0, %v1136_v58 }
  0x63   : > { %v1140_v62 = vpop.eup %1139  ;;  %1153 = vrcp.f32 %v350_v59  ;;  %v352_v63 = vadd.f32 1.0, %v1138_v60  ;;  %v456_v59 = vld [vmem:[%s1243_s19 + $0xb0] sm:$0xff]  ;;  %v457_v60 = vld [vmem:[%s1243_s19 + $0xb8] sm:$0xff] }
  0x64   : > { %661 = vperm.xlu1 %998, %v1120_v45   ;;  %v1142_v0 = vpop.eup %1141  ;;  %1155 = vrcp.f32 %v353_v61  ;;  %v454_v61 = vld [vmem:[%s1243_s19 + $0xa0] sm:$0xff] }
  0x65   : > { %656 = vperm.xlu0 %997, %v1122_v46   ;;  %1157 = vrcp.f32 %v352_v63 }
  0x68   : > { %671 = vperm.xlu1 %998, %v1140_v62   ;;  %v455_v62 = vld [vmem:[%s1243_s19 + $0xa8] sm:$0xff] }
  0x69   : > { %666 = vperm.xlu0 %997, %v1142_v0  }
  0x6b   : > { %v1144_v1 = vpop.eup %1143 }
  0x6c   : > { %v1146_v2 = vpop.eup %1145  ;;  %681 = vperm.xlu1 %998, %v1144_v1  }
  0x6d   : > { %v1148_v3 = vpop.eup %1147  ;;  %676 = vperm.xlu0 %997, %v1146_v2  }
  0x6e   : > { %v1150_v4 = vpop.eup %1149 }
  0x6f   : > { %v1152_v5 = vpop.eup %1151 }
  0x70   : > { %691 = vperm.xlu1 %998, %v1148_v3   ;;  %v1154_v6 = vpop.eup %1153 }
  0x71   : > { %686 = vperm.xlu0 %997, %v1150_v4   ;;  %v1156_v7 = vpop.eup %1155 }
  0x72   : > { %v1158_v8 = vpop.eup %1157 }
  0x74   : > { %701 = vperm.xlu1 %998, %v1152_v5   ;;  %v460_v5 = vld [vmem:[%s1243_s19 + $0xd0] sm:$0xff] }
  0x75   : > { %696 = vperm.xlu0 %997, %v1154_v6   ;;  %v461_v6 = vld [vmem:[%s1243_s19 + $0xd8] sm:$0xff] }
  0x78   : > { %711 = vperm.xlu1 %998, %v1156_v7   ;;  %v458_v7 = vld [vmem:[%s1243_s19 + $0xc0] sm:$0xff] }
  0x79   : > { %706 = vperm.xlu0 %997, %v1158_v8   ;;  %v459_v8 = vld [vmem:[%s1243_s19 + $0xc8] sm:$0xff] }
  0xa7   : > { %v527_v13 = vpop.permute.xlu1 %526 }
  0xa8   : > { %v718_v14 = vmul.f32 %v527_v13, %v438_v9  ;;  %v719_v15 = vmul.f32 %v527_v13, %v439_v10  ;;  %v517_v16 = vpop.permute.xlu0 %516 }
  0xa9   : > { %v714_v17 = vmul.f32 %v517_v16, %v434_v11  ;;  %v715_v18 = vmul.f32 %v517_v16, %v435_v12  ;;  %v465_v16 = vld [vmem:[%s1243_s19 + $0xf8] sm:$0xff] }
  0xaa   : > { %799 = vst [vmem:[%s1252_s22 + $0x20] sm:$0xff] %v718_v14  ;;  %800 = vst.msk [vmem:[%s1252_s22 + $0x28] sm:$0xff] %vm795_vm0, %v719_v15  ;;  %v464_v15 = vld [vmem:[%s1243_s19 + $0xf0] sm:$0xff] }
  0xab   : > { %794 = vst [vmem:[%s1252_s22] sm:$0xff] %v714_v17  ;;  %796 = vst.msk [vmem:[%s1252_s22 + $0x8] sm:$0xff] %vm795_vm0, %v715_v18  ;;  %v532_v23 = vpop.permute.xlu1 %531  ;;  %v462_v17 = vld [vmem:[%s1243_s19 + $0xe0] sm:$0xff]  ;;  %v463_v18 = vld [vmem:[%s1243_s19 + $0xe8] sm:$0xff] }
  0xac   : > { %v720_v24 = vmul.f32 %v532_v23, %v440_v19  ;;  %v721_v25 = vmul.f32 %v532_v23, %v441_v20  ;;  %v522_v26 = vpop.permute.xlu0 %521 }
  0xad   : > { %v716_v27 = vmul.f32 %v522_v26, %v436_v21  ;;  %v717_v28 = vmul.f32 %v522_v26, %v437_v22  ;;  %v469_v26 = vld [vmem:[%s1243_s19 + $0x118] sm:$0xff] }
  0xae   : > { %801 = vst [vmem:[%s1252_s22 + $0x30] sm:$0xff] %v720_v24  ;;  %802 = vst.msk [vmem:[%s1252_s22 + $0x38] sm:$0xff] %vm795_vm0, %v721_v25  ;;  %v468_v25 = vld [vmem:[%s1243_s19 + $0x110] sm:$0xff] }
  0xaf   : > { %797 = vst [vmem:[%s1252_s22 + $0x10] sm:$0xff] %v716_v27  ;;  %798 = vst.msk [vmem:[%s1252_s22 + $0x18] sm:$0xff] %vm795_vm0, %v717_v28  ;;  %v542_v33 = vpop.permute.xlu1 %541  ;;  %v466_v27 = vld [vmem:[%s1243_s19 + $0x100] sm:$0xff]  ;;  %v467_v28 = vld [vmem:[%s1243_s19 + $0x108] sm:$0xff] }
  0xb0   : > { %v724_v34 = vmul.f32 %v542_v33, %v444_v29  ;;  %v725_v35 = vmul.f32 %v542_v33, %v445_v30  ;;  %v537_v36 = vpop.permute.xlu0 %536 }
  0xb1   : > { %v722_v37 = vmul.f32 %v537_v36, %v442_v31  ;;  %v723_v38 = vmul.f32 %v537_v36, %v443_v32  ;;  %v473_v36 = vld [vmem:[%s1243_s19 + $0x138] sm:$0xff] }
  0xb2   : > { %805 = vst [vmem:[%s1252_s22 + $0x50] sm:$0xff] %v724_v34  ;;  %806 = vst.msk [vmem:[%s1252_s22 + $0x58] sm:$0xff] %vm795_vm0, %v725_v35  ;;  %v472_v35 = vld [vmem:[%s1243_s19 + $0x130] sm:$0xff] }
  0xb3   : > { %803 = vst [vmem:[%s1252_s22 + $0x40] sm:$0xff] %v722_v37  ;;  %804 = vst.msk [vmem:[%s1252_s22 + $0x48] sm:$0xff] %vm795_vm0, %v723_v38  ;;  %v552_v43 = vpop.permute.xlu1 %551  ;;  %v470_v37 = vld [vmem:[%s1243_s19 + $0x120] sm:$0xff]  ;;  %v471_v38 = vld [vmem:[%s1243_s19 + $0x128] sm:$0xff] }
  0xb4   : > { %v728_v44 = vmul.f32 %v552_v43, %v448_v39  ;;  %v729_v45 = vmul.f32 %v552_v43, %v449_v40  ;;  %v547_v46 = vpop.permute.xlu0 %546 }
  0xb5   : > { %v726_v47 = vmul.f32 %v547_v46, %v446_v41  ;;  %v727_v48 = vmul.f32 %v547_v46, %v447_v42  ;;  %v477_v46 = vld [vmem:[%s1243_s19 + $0x158] sm:$0xff] }
  0xb6   : > { %809 = vst [vmem:[%s1252_s22 + $0x70] sm:$0xff] %v728_v44  ;;  %810 = vst.msk [vmem:[%s1252_s22 + $0x78] sm:$0xff] %vm795_vm0, %v729_v45  ;;  %v476_v45 = vld [vmem:[%s1243_s19 + $0x150] sm:$0xff] }
  0xb7   : > { %807 = vst [vmem:[%s1252_s22 + $0x60] sm:$0xff] %v726_v47  ;;  %808 = vst.msk [vmem:[%s1252_s22 + $0x68] sm:$0xff] %vm795_vm0, %v727_v48  ;;  %v562_v53 = vpop.permute.xlu1 %561  ;;  %v474_v47 = vld [vmem:[%s1243_s19 + $0x140] sm:$0xff]  ;;  %v475_v48 = vld [vmem:[%s1243_s19 + $0x148] sm:$0xff] }
  0xb8   : > { %v732_v54 = vmul.f32 %v562_v53, %v452_v49  ;;  %v733_v55 = vmul.f32 %v562_v53, %v453_v50  ;;  %v557_v56 = vpop.permute.xlu0 %556 }
  0xb9   : > { %v730_v57 = vmul.f32 %v557_v56, %v450_v51  ;;  %v731_v58 = vmul.f32 %v557_v56, %v451_v52  ;;  %v481_v56 = vld [vmem:[%s1243_s19 + $0x178] sm:$0xff] }
  0xba   : > { %813 = vst [vmem:[%s1252_s22 + $0x90] sm:$0xff] %v732_v54  ;;  %814 = vst.msk [vmem:[%s1252_s22 + $0x98] sm:$0xff] %vm795_vm0, %v733_v55  ;;  %v480_v55 = vld [vmem:[%s1243_s19 + $0x170] sm:$0xff] }
  0xbb   : > { %811 = vst [vmem:[%s1252_s22 + $0x80] sm:$0xff] %v730_v57  ;;  %812 = vst.msk [vmem:[%s1252_s22 + $0x88] sm:$0xff] %vm795_vm0, %v731_v58  ;;  %v572_v63 = vpop.permute.xlu1 %571  ;;  %v478_v57 = vld [vmem:[%s1243_s19 + $0x160] sm:$0xff]  ;;  %v479_v58 = vld [vmem:[%s1243_s19 + $0x168] sm:$0xff] }
  0xbc   : > { %v736_v0 = vmul.f32 %v572_v63, %v456_v59  ;;  %v737_v1 = vmul.f32 %v572_v63, %v457_v60  ;;  %v567_v2 = vpop.permute.xlu0 %566 }
  0xbd   : > { %v734_v3 = vmul.f32 %v567_v2, %v454_v61  ;;  %v735_v4 = vmul.f32 %v567_v2, %v455_v62  ;;  %v485_v2 = vld [vmem:[%s1243_s19 + $0x198] sm:$0xff] }
  0xbe   : > { %817 = vst [vmem:[%s1252_s22 + $0xb0] sm:$0xff] %v736_v0  ;;  %818 = vst.msk [vmem:[%s1252_s22 + $0xb8] sm:$0xff] %vm795_vm0, %v737_v1  ;;  %v484_v1 = vld [vmem:[%s1243_s19 + $0x190] sm:$0xff] }
  0xbf   : > { %815 = vst [vmem:[%s1252_s22 + $0xa0] sm:$0xff] %v734_v3  ;;  %816 = vst.msk [vmem:[%s1252_s22 + $0xa8] sm:$0xff] %vm795_vm0, %v735_v4  ;;  %v582_v9 = vpop.permute.xlu1 %581  ;;  %v482_v3 = vld [vmem:[%s1243_s19 + $0x180] sm:$0xff]  ;;  %v483_v4 = vld [vmem:[%s1243_s19 + $0x188] sm:$0xff] }
  0xc0   : > { %v740_v10 = vmul.f32 %v582_v9, %v460_v5  ;;  %v741_v11 = vmul.f32 %v582_v9, %v461_v6  ;;  %v577_v12 = vpop.permute.xlu0 %576 }
  0xc1   : > { %v738_v13 = vmul.f32 %v577_v12, %v458_v7  ;;  %v739_v14 = vmul.f32 %v577_v12, %v459_v8  ;;  %v489_v12 = vld [vmem:[%s1243_s19 + $0x1b8] sm:$0xff] }
  0xc2   : > { %821 = vst [vmem:[%s1252_s22 + $0xd0] sm:$0xff] %v740_v10  ;;  %822 = vst.msk [vmem:[%s1252_s22 + $0xd8] sm:$0xff] %vm795_vm0, %v741_v11  ;;  %v488_v11 = vld [vmem:[%s1243_s19 + $0x1b0] sm:$0xff] }
  0xc3   : > { %819 = vst [vmem:[%s1252_s22 + $0xc0] sm:$0xff] %v738_v13  ;;  %820 = vst.msk [vmem:[%s1252_s22 + $0xc8] sm:$0xff] %vm795_vm0, %v739_v14  ;;  %v592_v19 = vpop.permute.xlu1 %591  ;;  %v486_v13 = vld [vmem:[%s1243_s19 + $0x1a0] sm:$0xff]  ;;  %v487_v14 = vld [vmem:[%s1243_s19 + $0x1a8] sm:$0xff] }
  0xc4   : > { %v744_v20 = vmul.f32 %v592_v19, %v464_v15  ;;  %v745_v21 = vmul.f32 %v592_v19, %v465_v16  ;;  %v587_v22 = vpop.permute.xlu0 %586 }
  0xc5   : > { %v742_v23 = vmul.f32 %v587_v22, %v462_v17  ;;  %v743_v24 = vmul.f32 %v587_v22, %v463_v18  ;;  %v493_v22 = vld [vmem:[%s1243_s19 + $0x1d8] sm:$0xff] }
  0xc6   : > { %825 = vst [vmem:[%s1252_s22 + $0xf0] sm:$0xff] %v744_v20  ;;  %826 = vst.msk [vmem:[%s1252_s22 + $0xf8] sm:$0xff] %vm795_vm0, %v745_v21  ;;  %v492_v21 = vld [vmem:[%s1243_s19 + $0x1d0] sm:$0xff] }
  0xc7   : > { %823 = vst [vmem:[%s1252_s22 + $0xe0] sm:$0xff] %v742_v23  ;;  %824 = vst.msk [vmem:[%s1252_s22 + $0xe8] sm:$0xff] %vm795_vm0, %v743_v24  ;;  %v602_v29 = vpop.permute.xlu1 %601  ;;  %v490_v23 = vld [vmem:[%s1243_s19 + $0x1c0] sm:$0xff]  ;;  %v491_v24 = vld [vmem:[%s1243_s19 + $0x1c8] sm:$0xff] }
  0xc8   : > { %v748_v30 = vmul.f32 %v602_v29, %v468_v25  ;;  %v749_v31 = vmul.f32 %v602_v29, %v469_v26  ;;  %v597_v32 = vpop.permute.xlu0 %596 }
  0xc9   : > { %v746_v33 = vmul.f32 %v597_v32, %v466_v27  ;;  %v747_v34 = vmul.f32 %v597_v32, %v467_v28  ;;  %v497_v32 = vld [vmem:[%s1243_s19 + $0x1f8] sm:$0xff] }
  0xca   : > { %829 = vst [vmem:[%s1252_s22 + $0x110] sm:$0xff] %v748_v30  ;;  %830 = vst.msk [vmem:[%s1252_s22 + $0x118] sm:$0xff] %vm795_vm0, %v749_v31  ;;  %v496_v31 = vld [vmem:[%s1243_s19 + $0x1f0] sm:$0xff] }
  0xcb   : > { %827 = vst [vmem:[%s1252_s22 + $0x100] sm:$0xff] %v746_v33  ;;  %828 = vst.msk [vmem:[%s1252_s22 + $0x108] sm:$0xff] %vm795_vm0, %v747_v34  ;;  %v612_v39 = vpop.permute.xlu1 %611  ;;  %v494_v33 = vld [vmem:[%s1243_s19 + $0x1e0] sm:$0xff]  ;;  %v495_v34 = vld [vmem:[%s1243_s19 + $0x1e8] sm:$0xff] }
  0xcc   : > { %v752_v40 = vmul.f32 %v612_v39, %v472_v35  ;;  %v753_v41 = vmul.f32 %v612_v39, %v473_v36  ;;  %v607_v42 = vpop.permute.xlu0 %606 }
  0xcd   : > { %v750_v43 = vmul.f32 %v607_v42, %v470_v37  ;;  %v751_v44 = vmul.f32 %v607_v42, %v471_v38  ;;  %v501_v42 = vld [vmem:[%s1243_s19 + $0x218] sm:$0xff] }
  0xce   : > { %833 = vst [vmem:[%s1252_s22 + $0x130] sm:$0xff] %v752_v40  ;;  %834 = vst.msk [vmem:[%s1252_s22 + $0x138] sm:$0xff] %vm795_vm0, %v753_v41  ;;  %v500_v41 = vld [vmem:[%s1243_s19 + $0x210] sm:$0xff] }
  0xcf   : > { %831 = vst [vmem:[%s1252_s22 + $0x120] sm:$0xff] %v750_v43  ;;  %832 = vst.msk [vmem:[%s1252_s22 + $0x128] sm:$0xff] %vm795_vm0, %v751_v44  ;;  %v622_v49 = vpop.permute.xlu1 %621  ;;  %v498_v43 = vld [vmem:[%s1243_s19 + $0x200] sm:$0xff]  ;;  %v499_v44 = vld [vmem:[%s1243_s19 + $0x208] sm:$0xff] }
  0xd0   : > { %v756_v50 = vmul.f32 %v622_v49, %v476_v45  ;;  %v757_v51 = vmul.f32 %v622_v49, %v477_v46  ;;  %v617_v52 = vpop.permute.xlu0 %616 }
  0xd1   : > { %v754_v53 = vmul.f32 %v617_v52, %v474_v47  ;;  %v755_v54 = vmul.f32 %v617_v52, %v475_v48  ;;  %v505_v52 = vld [vmem:[%s1243_s19 + $0x238] sm:$0xff] }
  0xd2   : > { %837 = vst [vmem:[%s1252_s22 + $0x150] sm:$0xff] %v756_v50  ;;  %838 = vst.msk [vmem:[%s1252_s22 + $0x158] sm:$0xff] %vm795_vm0, %v757_v51  ;;  %v504_v51 = vld [vmem:[%s1243_s19 + $0x230] sm:$0xff] }
  0xd3   : > { %835 = vst [vmem:[%s1252_s22 + $0x140] sm:$0xff] %v754_v53  ;;  %836 = vst.msk [vmem:[%s1252_s22 + $0x148] sm:$0xff] %vm795_vm0, %v755_v54  ;;  %v632_v59 = vpop.permute.xlu1 %631  ;;  %v502_v53 = vld [vmem:[%s1243_s19 + $0x220] sm:$0xff]  ;;  %v503_v54 = vld [vmem:[%s1243_s19 + $0x228] sm:$0xff] }
  0xd4   : > { %v760_v60 = vmul.f32 %v632_v59, %v480_v55  ;;  %v761_v61 = vmul.f32 %v632_v59, %v481_v56  ;;  %v627_v62 = vpop.permute.xlu0 %626 }
  0xd5   : > { %v758_v63 = vmul.f32 %v627_v62, %v478_v57  ;;  %v759_v0 = vmul.f32 %v627_v62, %v479_v58  ;;  %v509_v62 = vld [vmem:[%s1243_s19 + $0x258] sm:$0xff] }
  0xd6   : > { %841 = vst [vmem:[%s1252_s22 + $0x170] sm:$0xff] %v760_v60  ;;  %842 = vst.msk [vmem:[%s1252_s22 + $0x178] sm:$0xff] %vm795_vm0, %v761_v61  ;;  %v508_v61 = vld [vmem:[%s1243_s19 + $0x250] sm:$0xff] }
  0xd7   : > { %839 = vst [vmem:[%s1252_s22 + $0x160] sm:$0xff] %v758_v63  ;;  %840 = vst.msk [vmem:[%s1252_s22 + $0x168] sm:$0xff] %vm795_vm0, %v759_v0  ;;  %v642_v5 = vpop.permute.xlu1 %641  ;;  %v506_v63 = vld [vmem:[%s1243_s19 + $0x240] sm:$0xff]  ;;  %v507_v0 = vld [vmem:[%s1243_s19 + $0x248] sm:$0xff] }
  0xd8   : > { %v764_v6 = vmul.f32 %v642_v5, %v484_v1  ;;  %v765_v7 = vmul.f32 %v642_v5, %v485_v2  ;;  %v637_v8 = vpop.permute.xlu0 %636 }
  0xd9   : > { %v762_v9 = vmul.f32 %v637_v8, %v482_v3  ;;  %v763_v10 = vmul.f32 %v637_v8, %v483_v4  ;;  %v513_v8 = vld [vmem:[%s1243_s19 + $0x278] sm:$0xff] }
  0xda   : > { %845 = vst [vmem:[%s1252_s22 + $0x190] sm:$0xff] %v764_v6  ;;  %846 = vst.msk [vmem:[%s1252_s22 + $0x198] sm:$0xff] %vm795_vm0, %v765_v7  ;;  %v512_v7 = vld [vmem:[%s1243_s19 + $0x270] sm:$0xff] }
  0xdb   : > { %843 = vst [vmem:[%s1252_s22 + $0x180] sm:$0xff] %v762_v9  ;;  %844 = vst.msk [vmem:[%s1252_s22 + $0x188] sm:$0xff] %vm795_vm0, %v763_v10  ;;  %v652_v15 = vpop.permute.xlu1 %651  ;;  %v510_v9 = vld [vmem:[%s1243_s19 + $0x260] sm:$0xff]  ;;  %v511_v10 = vld [vmem:[%s1243_s19 + $0x268] sm:$0xff] }
  0xdc   : > { %v768_v16 = vmul.f32 %v652_v15, %v488_v11  ;;  %v769_v17 = vmul.f32 %v652_v15, %v489_v12  ;;  %v647_v18 = vpop.permute.xlu0 %646 }
  0xdd   : > { %v766_v19 = vmul.f32 %v647_v18, %v486_v13  ;;  %v767_v20 = vmul.f32 %v647_v18, %v487_v14 }
  0xde   : > { %849 = vst [vmem:[%s1252_s22 + $0x1b0] sm:$0xff] %v768_v16  ;;  %850 = vst.msk [vmem:[%s1252_s22 + $0x1b8] sm:$0xff] %vm795_vm0, %v769_v17 }
  0xdf   : > { %847 = vst [vmem:[%s1252_s22 + $0x1a0] sm:$0xff] %v766_v19  ;;  %848 = vst.msk [vmem:[%s1252_s22 + $0x1a8] sm:$0xff] %vm795_vm0, %v767_v20  ;;  %v662_v25 = vpop.permute.xlu1 %661 }
  0xe0   : > { %v772_v26 = vmul.f32 %v662_v25, %v492_v21  ;;  %v773_v27 = vmul.f32 %v662_v25, %v493_v22  ;;  %v657_v28 = vpop.permute.xlu0 %656 }
  0xe1   : > { %v770_v29 = vmul.f32 %v657_v28, %v490_v23  ;;  %v771_v30 = vmul.f32 %v657_v28, %v491_v24 }
  0xe2   : > { %853 = vst [vmem:[%s1252_s22 + $0x1d0] sm:$0xff] %v772_v26  ;;  %854 = vst.msk [vmem:[%s1252_s22 + $0x1d8] sm:$0xff] %vm795_vm0, %v773_v27 }
  0xe3   : > { %851 = vst [vmem:[%s1252_s22 + $0x1c0] sm:$0xff] %v770_v29  ;;  %852 = vst.msk [vmem:[%s1252_s22 + $0x1c8] sm:$0xff] %vm795_vm0, %v771_v30  ;;  %v672_v35 = vpop.permute.xlu1 %671 }
  0xe4   : > { %v776_v36 = vmul.f32 %v672_v35, %v496_v31  ;;  %v777_v37 = vmul.f32 %v672_v35, %v497_v32  ;;  %v667_v38 = vpop.permute.xlu0 %666 }
  0xe5   : > { %v774_v39 = vmul.f32 %v667_v38, %v494_v33  ;;  %v775_v40 = vmul.f32 %v667_v38, %v495_v34 }
  0xe6   : > { %857 = vst [vmem:[%s1252_s22 + $0x1f0] sm:$0xff] %v776_v36  ;;  %858 = vst.msk [vmem:[%s1252_s22 + $0x1f8] sm:$0xff] %vm795_vm0, %v777_v37 }
  0xe7   : > { %855 = vst [vmem:[%s1252_s22 + $0x1e0] sm:$0xff] %v774_v39  ;;  %856 = vst.msk [vmem:[%s1252_s22 + $0x1e8] sm:$0xff] %vm795_vm0, %v775_v40  ;;  %v682_v45 = vpop.permute.xlu1 %681 }
  0xe8   : > { %v780_v46 = vmul.f32 %v682_v45, %v500_v41  ;;  %v781_v47 = vmul.f32 %v682_v45, %v501_v42  ;;  %v677_v48 = vpop.permute.xlu0 %676 }
  0xe9   : > { %v778_v49 = vmul.f32 %v677_v48, %v498_v43  ;;  %v779_v50 = vmul.f32 %v677_v48, %v499_v44 }
  0xea   : > { %861 = vst [vmem:[%s1252_s22 + $0x210] sm:$0xff] %v780_v46  ;;  %862 = vst.msk [vmem:[%s1252_s22 + $0x218] sm:$0xff] %vm795_vm0, %v781_v47 }
  0xeb   : > { %859 = vst [vmem:[%s1252_s22 + $0x200] sm:$0xff] %v778_v49  ;;  %860 = vst.msk [vmem:[%s1252_s22 + $0x208] sm:$0xff] %vm795_vm0, %v779_v50  ;;  %v692_v55 = vpop.permute.xlu1 %691 }
  0xec   : > { %v784_v56 = vmul.f32 %v692_v55, %v504_v51  ;;  %v785_v57 = vmul.f32 %v692_v55, %v505_v52  ;;  %v687_v58 = vpop.permute.xlu0 %686 }
  0xed   : > { %v782_v59 = vmul.f32 %v687_v58, %v502_v53  ;;  %v783_v60 = vmul.f32 %v687_v58, %v503_v54 }
  0xee   : > { %865 = vst [vmem:[%s1252_s22 + $0x230] sm:$0xff] %v784_v56  ;;  %866 = vst.msk [vmem:[%s1252_s22 + $0x238] sm:$0xff] %vm795_vm0, %v785_v57 }
  0xef   : > { %863 = vst [vmem:[%s1252_s22 + $0x220] sm:$0xff] %v782_v59  ;;  %864 = vst.msk [vmem:[%s1252_s22 + $0x228] sm:$0xff] %vm795_vm0, %v783_v60  ;;  %v702_v1 = vpop.permute.xlu1 %701 }
  0xf0   : > { %v788_v2 = vmul.f32 %v702_v1, %v508_v61  ;;  %v789_v3 = vmul.f32 %v702_v1, %v509_v62  ;;  %v697_v4 = vpop.permute.xlu0 %696 }
  0xf1   : > { %v786_v5 = vmul.f32 %v697_v4, %v506_v63  ;;  %v787_v6 = vmul.f32 %v697_v4, %v507_v0 }
  0xf2   : > { %869 = vst [vmem:[%s1252_s22 + $0x250] sm:$0xff] %v788_v2  ;;  %870 = vst.msk [vmem:[%s1252_s22 + $0x258] sm:$0xff] %vm795_vm0, %v789_v3 }
  0xf3   : > { %867 = vst [vmem:[%s1252_s22 + $0x240] sm:$0xff] %v786_v5  ;;  %868 = vst.msk [vmem:[%s1252_s22 + $0x248] sm:$0xff] %vm795_vm0, %v787_v6  ;;  %v712_v11 = vpop.permute.xlu1 %711 }
  0xf4   : > { %v792_v12 = vmul.f32 %v712_v11, %v512_v7  ;;  %v793_v13 = vmul.f32 %v712_v11, %v513_v8  ;;  %v707_v14 = vpop.permute.xlu0 %706 }
  0xf5   : > { %v790_v15 = vmul.f32 %v707_v14, %v510_v9  ;;  %v791_v16 = vmul.f32 %v707_v14, %v511_v10 }
  0xf6   : > { %873 = vst [vmem:[%s1252_s22 + $0x270] sm:$0xff] %v792_v12  ;;  %874 = vst.msk [vmem:[%s1252_s22 + $0x278] sm:$0xff] %vm795_vm0, %v793_v13 }
  0xf7   : > { %871 = vst [vmem:[%s1252_s22 + $0x260] sm:$0xff] %v790_v15  ;;  %872 = vst.msk [vmem:[%s1252_s22 + $0x268] sm:$0xff] %vm795_vm0, %v791_v16 }
  0xf8 PF: > { %s12_s9 = sadd.s32 1, %s1165_s9  }
  0xf9   : > { %p9_p4 = scmp.ge.s32.totalorder %s12_s9, 4  }
  0xfb   :  { %11 = sbr.rel (!%p9_p4) target bundleno = 1 (0x1), region = 59 }

</bundles_post_ra>
